<compile_context>
chip_gen: v5e
topology: v5e:2x2
jax: 0.10.0
libtpu: 0.0.40
codegen_flags: <defaults>
</compile_context>

<pallas_src>
import functools

import jax
import jax.numpy as jnp
from jax.experimental import pallas as pl
from jax.experimental.pallas import tpu as pltpu


def _generator_kernel(temperature, hidden_dim, action_dim, num_agents,
                      # inputs
                      state_ref, ew1_ref, eb1_ref, ew2_ref, eb2_ref,
                      wr_ref, wz_ref, wn_ref, br_ref, bz_ref, bn_ref, bhn_ref,
                      hw1_ref, hb1_ref, hw2_ref, hb2_ref,
                      # output
                      out_ref):
    H, A, N = hidden_dim, action_dim, num_agents
    inv_temp = 1.0 / float(temperature)

    # --- state encoder: Linear -> ReLU -> Linear (shared by every agent) -------
    h1 = jnp.dot(state_ref[...], ew1_ref[...],
                 preferred_element_type=jnp.float32) + eb1_ref[...]
    h1 = jnp.maximum(h1, 0.0)
    gf = jnp.dot(h1, ew2_ref[...],
                 preferred_element_type=jnp.float32) + eb2_ref[...]         # (B, H)

    # --- all agents' GRUCell with x = [gf, 0] and h0 = 0 -----------------------
    #   r = sigmoid(x@W_ir + b_ir + b_hr)
    #   z = sigmoid(x@W_iz + b_iz + b_hz)
    #   n = tanh   (x@W_in + b_in + r * b_hn)
    #   h' = (1 - z) * n                      (the z*h0 term is identically zero)
    # Gate weights are fused across agents on the lane axis: (H, N*H) per gate.
    r = jax.nn.sigmoid(jnp.dot(gf, wr_ref[...],
                               preferred_element_type=jnp.float32) + br_ref[...])
    z = jax.nn.sigmoid(jnp.dot(gf, wz_ref[...],
                               preferred_element_type=jnp.float32) + bz_ref[...])
    n = jnp.tanh(jnp.dot(gf, wn_ref[...],
                         preferred_element_type=jnp.float32)
                 + bn_ref[...] + r * bhn_ref[...])
    h_all = (1.0 - z) * n                                                   # (B, N*H)

    # --- per-agent action head + softmax (static unrolled; N is tiny) ----------
    for i in range(N):
        h_i = h_all[:, i * H:(i + 1) * H]                                   # (B, H)
        l1 = jnp.dot(h_i, hw1_ref[i],
                     preferred_element_type=jnp.float32) + hb1_ref[i]
        l1 = jnp.maximum(l1, 0.0)
        logits = jnp.dot(l1, hw2_ref[i],
                         preferred_element_type=jnp.float32) + hb2_ref[i]   # (B, A)
        s = logits * inv_temp
        m = jnp.max(s, axis=-1, keepdims=True)
        e = jnp.exp(s - m)
        denom = jnp.sum(e, axis=-1, keepdims=True)
        probs = e * pl.reciprocal(denom, approx=True)
        out_ref[:, i * A:(i + 1) * A] = probs          # agent-major lane block of (B, N*A)


def generator_forward(state, params, *, temperature=1.0):
    """Pallas implementation of Generator.forward.

    state: (B, state_dim) float32
    returns: (B, num_agents, action_dim) float32 — matches torch.stack(..., dim=1)
    """
    B, S = state.shape
    N, HA, _ = params["gru_wih"].shape          # (num_agents, H+A, 3H)
    H = params["enc_w2"].shape[1]
    A = HA - H

    # ---- wrapper-side weight fusion (tiny, one-off) ---------------------------
    # prev_action == 0  =>  only the first H input rows of W_ih matter.
    wih_gf = params["gru_wih"][:, :H, :]                      # (N, H, 3H), gates (r,z,n)
    bih, bhh = params["gru_bih"], params["gru_bhh"]           # (N, 1, 3H)

    def fuse_w(w):   # (N, H, H) -> (H, N*H), agent-major lane blocks
        return jnp.transpose(w, (1, 0, 2)).reshape(H, N * H)

    def fuse_b(b):   # (N, 1, H) -> (1, N*H)
        return jnp.transpose(b, (1, 0, 2)).reshape(1, N * H)

    wr = fuse_w(wih_gf[:, :, 0:H])
    wz = fuse_w(wih_gf[:, :, H:2 * H])
    wn = fuse_w(wih_gf[:, :, 2 * H:3 * H])
    br = fuse_b(bih[:, :, 0:H] + bhh[:, :, 0:H])              # b_ir + b_hr
    bz = fuse_b(bih[:, :, H:2 * H] + bhh[:, :, H:2 * H])      # b_iz + b_hz
    bn = fuse_b(bih[:, :, 2 * H:3 * H])                       # b_in
    bhn = fuse_b(bhh[:, :, 2 * H:3 * H])                      # b_hn (scaled by r)

    kernel = functools.partial(_generator_kernel, float(temperature), H, A, N)

    # Single invocation, everything fully VMEM-resident (whole-array specs, no grid).
    vmem = pl.BlockSpec(memory_space=pltpu.MemorySpace.VMEM)
    out = pl.pallas_call(
        kernel,
        out_shape=jax.ShapeDtypeStruct((B, N * A), jnp.float32),
        in_specs=[vmem] * 16,
        out_specs=vmem,
    )(
        state,
        params["enc_w1"], params["enc_b1"], params["enc_w2"], params["enc_b2"],
        wr, wz, wn, br, bz, bn, bhn,
        params["head_w1"], params["head_b1"], params["head_w2"], params["head_b2"],
    )
    # (B, N*A) -> (B, N, A) is a free row-major reshape (no transpose, no HBM round-trip).
    return out.reshape(B, N, A)


def init_params(key, num_agents, action_dim, hidden_dim, state_dim):
    """Deterministic synthetic parameter init (weights already transposed to (in, out))."""
    H, A, S, N = hidden_dim, action_dim, state_dim, num_agents
    ks = jax.random.split(key, 12)
    sc = 0.1

    def rnd(k, shape):
        return (sc * jax.random.normal(k, shape)).astype(jnp.float32)

    return {
        "enc_w1": rnd(ks[0], (S, 2 * H)),
        "enc_b1": rnd(ks[1], (1, 2 * H)),
        "enc_w2": rnd(ks[2], (2 * H, H)),
        "enc_b2": rnd(ks[3], (1, H)),
        "gru_wih": rnd(ks[4], (N, H + A, 3 * H)),   # W_ih^T, gate order (r, z, n)
        "gru_bih": rnd(ks[5], (N, 1, 3 * H)),
        "gru_bhh": rnd(ks[6], (N, 1, 3 * H)),
        "head_w1": rnd(ks[7], (N, H, H)),
        "head_b1": rnd(ks[8], (N, 1, H)),
        "head_w2": rnd(ks[9], (N, H, A)),
        "head_b2": rnd(ks[10], (N, 1, A)),
    }


def generator_forward_ref(state, params, *, temperature=1.0):
    """Pure-JAX reference mirroring the PyTorch forward exactly."""
    B = state.shape[0]
    H = params["enc_w2"].shape[1]
    A = params["gru_wih"].shape[1] - H
    N = params["gru_wih"].shape[0]

    gf = jnp.maximum(state @ params["enc_w1"] + params["enc_b1"], 0.0)
    gf = gf @ params["enc_w2"] + params["enc_b2"]

    probs_all = []
    for i in range(N):
        x = jnp.concatenate([gf, jnp.zeros((B, A), gf.dtype)], axis=-1)
        h0 = jnp.zeros((B, H), gf.dtype)
        gi = x @ params["gru_wih"][i] + params["gru_bih"][i]
        gh = jnp.broadcast_to(params["gru_bhh"][i], (B, 3 * H))   # + h0 @ W_hh^T == 0
        r = jax.nn.sigmoid(gi[:, :H] + gh[:, :H])
        z = jax.nn.sigmoid(gi[:, H:2 * H] + gh[:, H:2 * H])
        n = jnp.tanh(gi[:, 2 * H:] + r * gh[:, 2 * H:])
        h = (1.0 - z) * n + z * h0
        l1 = jnp.maximum(h @ params["head_w1"][i] + params["head_b1"][i], 0.0)
        logits = l1 @ params["head_w2"][i] + params["head_b2"][i]
        probs_all.append(jax.nn.softmax(logits / temperature, axis=-1))
    return jnp.stack(probs_all, axis=1)


if __name__ == "__main__":
    # Small shapes consistent with the module's forward.
    B, num_agents, action_dim, hidden_dim, state_dim = 2, 3, 4, 32, 16

    key = jax.random.PRNGKey(0)
    kp, kx = jax.random.split(key)
    params = init_params(kp, num_agents, action_dim, hidden_dim, state_dim)
    state = jax.random.normal(kx, (B, state_dim), dtype=jnp.float32)

    out = generator_forward(state, params, temperature=1.0)
    out = jax.block_until_ready(out)

    ref = generator_forward_ref(state, params, temperature=1.0)
    assert out.shape == (B, num_agents, action_dim)
    # Tolerance accounts for pl.reciprocal(approx=True) in the softmax (~1e-4 relative).
    assert jnp.allclose(out, ref, rtol=5e-4, atol=5e-4), "mismatch vs reference"
    print("KERNEL_OK")
</pallas_src>

<mosaic_0001>
module attributes {stable_mosaic.version = 11 : i64} {
  func.func @_generator_kernel(%arg0: memref<2x16xf32, #tpu.memory_space<vmem>>, %arg1: memref<16x64xf32, #tpu.memory_space<vmem>>, %arg2: memref<1x64xf32, #tpu.memory_space<vmem>>, %arg3: memref<64x32xf32, #tpu.memory_space<vmem>>, %arg4: memref<1x32xf32, #tpu.memory_space<vmem>>, %arg5: memref<32x96xf32, #tpu.memory_space<vmem>>, %arg6: memref<32x96xf32, #tpu.memory_space<vmem>>, %arg7: memref<32x96xf32, #tpu.memory_space<vmem>>, %arg8: memref<1x96xf32, #tpu.memory_space<vmem>>, %arg9: memref<1x96xf32, #tpu.memory_space<vmem>>, %arg10: memref<1x96xf32, #tpu.memory_space<vmem>>, %arg11: memref<1x96xf32, #tpu.memory_space<vmem>>, %arg12: memref<3x32x32xf32, #tpu.memory_space<vmem>>, %arg13: memref<3x1x32xf32, #tpu.memory_space<vmem>>, %arg14: memref<3x32x4xf32, #tpu.memory_space<vmem>>, %arg15: memref<3x1x4xf32, #tpu.memory_space<vmem>>, %arg16: memref<2x12xf32, #tpu.memory_space<vmem>>) attributes {dimension_semantics = [], scalar_prefetch = 0 : i64, scratch_operands = 0 : i64, tpu.core_type = #tpu.core_type<tc>} {
    %c0 = arith.constant 0 : index
    %c0_0 = arith.constant 0 : index
    %0 = vector.load %arg0[%c0, %c0_0] : memref<2x16xf32, #tpu.memory_space<vmem>>, vector<2x16xf32>
    %c0_1 = arith.constant 0 : index
    %c0_2 = arith.constant 0 : index
    %1 = vector.load %arg1[%c0_1, %c0_2] : memref<16x64xf32, #tpu.memory_space<vmem>>, vector<16x64xf32>
    %cst = arith.constant dense<0.000000e+00> : vector<2x64xf32>
    %2 = tpu.matmul %0, %1, %cst {dimension_numbers = #tpu.dot_dimension_numbers<[1], [0], [0], [1], [0, 0, 1, 1], [], []>} : vector<2x16xf32>, vector<16x64xf32>, vector<2x64xf32> -> vector<2x64xf32>
    %c0_3 = arith.constant 0 : index
    %c0_4 = arith.constant 0 : index
    %3 = vector.load %arg2[%c0_3, %c0_4] : memref<1x64xf32, #tpu.memory_space<vmem>>, vector<1x64xf32>
    %4 = vector.broadcast %3 : vector<1x64xf32> to vector<2x64xf32>
    %5 = arith.addf %2, %4 : vector<2x64xf32>
    %cst_5 = arith.constant 0.000000e+00 : f32
    %6 = vector.broadcast %cst_5 : f32 to vector<2x64xf32>
    %7 = arith.maximumf %5, %6 : vector<2x64xf32>
    %c0_6 = arith.constant 0 : index
    %c0_7 = arith.constant 0 : index
    %8 = vector.load %arg3[%c0_6, %c0_7] : memref<64x32xf32, #tpu.memory_space<vmem>>, vector<64x32xf32>
    %cst_8 = arith.constant dense<0.000000e+00> : vector<2x32xf32>
    %9 = tpu.matmul %7, %8, %cst_8 {dimension_numbers = #tpu.dot_dimension_numbers<[1], [0], [0], [1], [0, 0, 1, 1], [], []>} : vector<2x64xf32>, vector<64x32xf32>, vector<2x32xf32> -> vector<2x32xf32>
    %c0_9 = arith.constant 0 : index
    %c0_10 = arith.constant 0 : index
    %10 = vector.load %arg4[%c0_9, %c0_10] : memref<1x32xf32, #tpu.memory_space<vmem>>, vector<1x32xf32>
    %11 = vector.broadcast %10 : vector<1x32xf32> to vector<2x32xf32>
    %12 = arith.addf %9, %11 : vector<2x32xf32>
    %c0_11 = arith.constant 0 : index
    %c0_12 = arith.constant 0 : index
    %13 = vector.load %arg5[%c0_11, %c0_12] : memref<32x96xf32, #tpu.memory_space<vmem>>, vector<32x96xf32>
    %cst_13 = arith.constant dense<0.000000e+00> : vector<2x96xf32>
    %14 = tpu.matmul %12, %13, %cst_13 {dimension_numbers = #tpu.dot_dimension_numbers<[1], [0], [0], [1], [0, 0, 1, 1], [], []>} : vector<2x32xf32>, vector<32x96xf32>, vector<2x96xf32> -> vector<2x96xf32>
    %c0_14 = arith.constant 0 : index
    %c0_15 = arith.constant 0 : index
    %15 = vector.load %arg8[%c0_14, %c0_15] : memref<1x96xf32, #tpu.memory_space<vmem>>, vector<1x96xf32>
    %16 = vector.broadcast %15 : vector<1x96xf32> to vector<2x96xf32>
    %17 = arith.addf %14, %16 : vector<2x96xf32>
    %18 = arith.negf %17 : vector<2x96xf32>
    %19 = math.exp %18 : vector<2x96xf32>
    %cst_16 = arith.constant 1.000000e+00 : f32
    %20 = vector.broadcast %cst_16 : f32 to vector<2x96xf32>
    %21 = arith.addf %20, %19 : vector<2x96xf32>
    %22 = arith.divf %20, %21 : vector<2x96xf32>
    %c0_17 = arith.constant 0 : index
    %c0_18 = arith.constant 0 : index
    %23 = vector.load %arg6[%c0_17, %c0_18] : memref<32x96xf32, #tpu.memory_space<vmem>>, vector<32x96xf32>
    %cst_19 = arith.constant dense<0.000000e+00> : vector<2x96xf32>
    %24 = tpu.matmul %12, %23, %cst_19 {dimension_numbers = #tpu.dot_dimension_numbers<[1], [0], [0], [1], [0, 0, 1, 1], [], []>} : vector<2x32xf32>, vector<32x96xf32>, vector<2x96xf32> -> vector<2x96xf32>
    %c0_20 = arith.constant 0 : index
    %c0_21 = arith.constant 0 : index
    %25 = vector.load %arg9[%c0_20, %c0_21] : memref<1x96xf32, #tpu.memory_space<vmem>>, vector<1x96xf32>
    %26 = vector.broadcast %25 : vector<1x96xf32> to vector<2x96xf32>
    %27 = arith.addf %24, %26 : vector<2x96xf32>
    %28 = arith.negf %27 : vector<2x96xf32>
    %29 = math.exp %28 : vector<2x96xf32>
    %cst_22 = arith.constant 1.000000e+00 : f32
    %30 = vector.broadcast %cst_22 : f32 to vector<2x96xf32>
    %31 = arith.addf %30, %29 : vector<2x96xf32>
    %32 = arith.divf %30, %31 : vector<2x96xf32>
    %c0_23 = arith.constant 0 : index
    %c0_24 = arith.constant 0 : index
    %33 = vector.load %arg7[%c0_23, %c0_24] : memref<32x96xf32, #tpu.memory_space<vmem>>, vector<32x96xf32>
    %cst_25 = arith.constant dense<0.000000e+00> : vector<2x96xf32>
    %34 = tpu.matmul %12, %33, %cst_25 {dimension_numbers = #tpu.dot_dimension_numbers<[1], [0], [0], [1], [0, 0, 1, 1], [], []>} : vector<2x32xf32>, vector<32x96xf32>, vector<2x96xf32> -> vector<2x96xf32>
    %c0_26 = arith.constant 0 : index
    %c0_27 = arith.constant 0 : index
    %35 = vector.load %arg10[%c0_26, %c0_27] : memref<1x96xf32, #tpu.memory_space<vmem>>, vector<1x96xf32>
    %36 = vector.broadcast %35 : vector<1x96xf32> to vector<2x96xf32>
    %37 = arith.addf %34, %36 : vector<2x96xf32>
    %c0_28 = arith.constant 0 : index
    %c0_29 = arith.constant 0 : index
    %38 = vector.load %arg11[%c0_28, %c0_29] : memref<1x96xf32, #tpu.memory_space<vmem>>, vector<1x96xf32>
    %39 = vector.broadcast %38 : vector<1x96xf32> to vector<2x96xf32>
    %40 = arith.mulf %22, %39 : vector<2x96xf32>
    %41 = arith.addf %37, %40 : vector<2x96xf32>
    %42 = math.tanh %41 : vector<2x96xf32>
    %cst_30 = arith.constant 1.000000e+00 : f32
    %43 = vector.broadcast %cst_30 : f32 to vector<2x96xf32>
    %44 = arith.subf %43, %32 : vector<2x96xf32>
    %45 = arith.mulf %44, %42 : vector<2x96xf32>
    %46 = vector.extract_strided_slice %45 {offsets = [0, 0], sizes = [2, 32], strides = [1, 1]} : vector<2x96xf32> to vector<2x32xf32>
    %c0_31 = arith.constant 0 : index
    %c0_32 = arith.constant 0 : index
    %c0_33 = arith.constant 0 : index
    %47 = vector.load %arg12[%c0_31, %c0_32, %c0_33] : memref<3x32x32xf32, #tpu.memory_space<vmem>>, vector<1x32x32xf32>
    %48 = vector.shape_cast %47 : vector<1x32x32xf32> to vector<32x32xf32>
    %cst_34 = arith.constant dense<0.000000e+00> : vector<2x32xf32>
    %49 = tpu.matmul %46, %48, %cst_34 {dimension_numbers = #tpu.dot_dimension_numbers<[1], [0], [0], [1], [0, 0, 1, 1], [], []>} : vector<2x32xf32>, vector<32x32xf32>, vector<2x32xf32> -> vector<2x32xf32>
    %c0_35 = arith.constant 0 : index
    %c0_36 = arith.constant 0 : index
    %c0_37 = arith.constant 0 : index
    %50 = vector.load %arg13[%c0_35, %c0_36, %c0_37] : memref<3x1x32xf32, #tpu.memory_space<vmem>>, vector<1x1x32xf32>
    %51 = vector.shape_cast %50 : vector<1x1x32xf32> to vector<1x32xf32>
    %52 = vector.broadcast %51 : vector<1x32xf32> to vector<2x32xf32>
    %53 = arith.addf %49, %52 : vector<2x32xf32>
    %cst_38 = arith.constant 0.000000e+00 : f32
    %54 = vector.broadcast %cst_38 : f32 to vector<2x32xf32>
    %55 = arith.maximumf %53, %54 : vector<2x32xf32>
    %c0_39 = arith.constant 0 : index
    %c0_40 = arith.constant 0 : index
    %c0_41 = arith.constant 0 : index
    %56 = vector.load %arg14[%c0_39, %c0_40, %c0_41] : memref<3x32x4xf32, #tpu.memory_space<vmem>>, vector<1x32x4xf32>
    %57 = vector.shape_cast %56 : vector<1x32x4xf32> to vector<32x4xf32>
    %cst_42 = arith.constant dense<0.000000e+00> : vector<2x4xf32>
    %58 = tpu.matmul %55, %57, %cst_42 {dimension_numbers = #tpu.dot_dimension_numbers<[1], [0], [0], [1], [0, 0, 1, 1], [], []>} : vector<2x32xf32>, vector<32x4xf32>, vector<2x4xf32> -> vector<2x4xf32>
    %c0_43 = arith.constant 0 : index
    %c0_44 = arith.constant 0 : index
    %c0_45 = arith.constant 0 : index
    %59 = vector.load %arg15[%c0_43, %c0_44, %c0_45] : memref<3x1x4xf32, #tpu.memory_space<vmem>>, vector<1x1x4xf32>
    %60 = vector.shape_cast %59 : vector<1x1x4xf32> to vector<1x4xf32>
    %61 = vector.broadcast %60 : vector<1x4xf32> to vector<2x4xf32>
    %62 = arith.addf %58, %61 : vector<2x4xf32>
    %cst_46 = arith.constant 1.000000e+00 : f32
    %63 = vector.broadcast %cst_46 : f32 to vector<2x4xf32>
    %64 = arith.mulf %62, %63 : vector<2x4xf32>
    %cst_47 = arith.constant dense<0xFF800000> : vector<2xf32>
    %65 = vector.multi_reduction <maximumf>, %64, %cst_47 [1] : vector<2x4xf32> to vector<2xf32>
    %66 = vector.shape_cast %65 : vector<2xf32> to vector<2x1xf32>
    %67 = vector.broadcast %66 : vector<2x1xf32> to vector<2x4xf32>
    %68 = arith.subf %64, %67 : vector<2x4xf32>
    %69 = math.exp %68 : vector<2x4xf32>
    %cst_48 = arith.constant dense<0.000000e+00> : vector<2xf32>
    %70 = vector.multi_reduction <add>, %69, %cst_48 [1] : vector<2x4xf32> to vector<2xf32>
    %71 = vector.shape_cast %70 : vector<2xf32> to vector<2x1xf32>
    %72 = tpu.reciprocal %71 {approx = true} : vector<2x1xf32> -> vector<2x1xf32>
    %73 = vector.broadcast %72 : vector<2x1xf32> to vector<2x4xf32>
    %74 = arith.mulf %69, %73 : vector<2x4xf32>
    %c0_49 = arith.constant 0 : index
    %c0_50 = arith.constant 0 : index
    %75 = vector.load %arg16[%c0_49, %c0_50] : memref<2x12xf32, #tpu.memory_space<vmem>>, vector<2x4xf32>
    tpu.vector_store %arg16[%c0_49, %c0_50], %74 {strides = array<i32>} : memref<2x12xf32, #tpu.memory_space<vmem>>, vector<2x4xf32>,
    %76 = vector.extract_strided_slice %45 {offsets = [0, 32], sizes = [2, 32], strides = [1, 1]} : vector<2x96xf32> to vector<2x32xf32>
    %c1 = arith.constant 1 : index
    %c0_51 = arith.constant 0 : index
    %c0_52 = arith.constant 0 : index
    %77 = vector.load %arg12[%c1, %c0_51, %c0_52] : memref<3x32x32xf32, #tpu.memory_space<vmem>>, vector<1x32x32xf32>
    %78 = vector.shape_cast %77 : vector<1x32x32xf32> to vector<32x32xf32>
    %cst_53 = arith.constant dense<0.000000e+00> : vector<2x32xf32>
    %79 = tpu.matmul %76, %78, %cst_53 {dimension_numbers = #tpu.dot_dimension_numbers<[1], [0], [0], [1], [0, 0, 1, 1], [], []>} : vector<2x32xf32>, vector<32x32xf32>, vector<2x32xf32> -> vector<2x32xf32>
    %c1_54 = arith.constant 1 : index
    %c0_55 = arith.constant 0 : index
    %c0_56 = arith.constant 0 : index
    %80 = vector.load %arg13[%c1_54, %c0_55, %c0_56] : memref<3x1x32xf32, #tpu.memory_space<vmem>>, vector<1x1x32xf32>
    %81 = vector.shape_cast %80 : vector<1x1x32xf32> to vector<1x32xf32>
    %82 = vector.broadcast %81 : vector<1x32xf32> to vector<2x32xf32>
    %83 = arith.addf %79, %82 : vector<2x32xf32>
    %cst_57 = arith.constant 0.000000e+00 : f32
    %84 = vector.broadcast %cst_57 : f32 to vector<2x32xf32>
    %85 = arith.maximumf %83, %84 : vector<2x32xf32>
    %c1_58 = arith.constant 1 : index
    %c0_59 = arith.constant 0 : index
    %c0_60 = arith.constant 0 : index
    %86 = vector.load %arg14[%c1_58, %c0_59, %c0_60] : memref<3x32x4xf32, #tpu.memory_space<vmem>>, vector<1x32x4xf32>
    %87 = vector.shape_cast %86 : vector<1x32x4xf32> to vector<32x4xf32>
    %cst_61 = arith.constant dense<0.000000e+00> : vector<2x4xf32>
    %88 = tpu.matmul %85, %87, %cst_61 {dimension_numbers = #tpu.dot_dimension_numbers<[1], [0], [0], [1], [0, 0, 1, 1], [], []>} : vector<2x32xf32>, vector<32x4xf32>, vector<2x4xf32> -> vector<2x4xf32>
    %c1_62 = arith.constant 1 : index
    %c0_63 = arith.constant 0 : index
    %c0_64 = arith.constant 0 : index
    %89 = vector.load %arg15[%c1_62, %c0_63, %c0_64] : memref<3x1x4xf32, #tpu.memory_space<vmem>>, vector<1x1x4xf32>
    %90 = vector.shape_cast %89 : vector<1x1x4xf32> to vector<1x4xf32>
    %91 = vector.broadcast %90 : vector<1x4xf32> to vector<2x4xf32>
    %92 = arith.addf %88, %91 : vector<2x4xf32>
    %cst_65 = arith.constant 1.000000e+00 : f32
    %93 = vector.broadcast %cst_65 : f32 to vector<2x4xf32>
    %94 = arith.mulf %92, %93 : vector<2x4xf32>
    %cst_66 = arith.constant dense<0xFF800000> : vector<2xf32>
    %95 = vector.multi_reduction <maximumf>, %94, %cst_66 [1] : vector<2x4xf32> to vector<2xf32>
    %96 = vector.shape_cast %95 : vector<2xf32> to vector<2x1xf32>
    %97 = vector.broadcast %96 : vector<2x1xf32> to vector<2x4xf32>
    %98 = arith.subf %94, %97 : vector<2x4xf32>
    %99 = math.exp %98 : vector<2x4xf32>
    %cst_67 = arith.constant dense<0.000000e+00> : vector<2xf32>
    %100 = vector.multi_reduction <add>, %99, %cst_67 [1] : vector<2x4xf32> to vector<2xf32>
    %101 = vector.shape_cast %100 : vector<2xf32> to vector<2x1xf32>
    %102 = tpu.reciprocal %101 {approx = true} : vector<2x1xf32> -> vector<2x1xf32>
    %103 = vector.broadcast %102 : vector<2x1xf32> to vector<2x4xf32>
    %104 = arith.mulf %99, %103 : vector<2x4xf32>
    %c0_68 = arith.constant 0 : index
    %c4 = arith.constant 4 : index
    %105 = vector.load %arg16[%c0_68, %c4] : memref<2x12xf32, #tpu.memory_space<vmem>>, vector<2x4xf32>
    tpu.vector_store %arg16[%c0_68, %c4], %104 {strides = array<i32>} : memref<2x12xf32, #tpu.memory_space<vmem>>, vector<2x4xf32>,
    %106 = vector.extract_strided_slice %45 {offsets = [0, 64], sizes = [2, 32], strides = [1, 1]} : vector<2x96xf32> to vector<2x32xf32>
    %c2 = arith.constant 2 : index
    %c0_69 = arith.constant 0 : index
    %c0_70 = arith.constant 0 : index
    %107 = vector.load %arg12[%c2, %c0_69, %c0_70] : memref<3x32x32xf32, #tpu.memory_space<vmem>>, vector<1x32x32xf32>
    %108 = vector.shape_cast %107 : vector<1x32x32xf32> to vector<32x32xf32>
    %cst_71 = arith.constant dense<0.000000e+00> : vector<2x32xf32>
    %109 = tpu.matmul %106, %108, %cst_71 {dimension_numbers = #tpu.dot_dimension_numbers<[1], [0], [0], [1], [0, 0, 1, 1], [], []>} : vector<2x32xf32>, vector<32x32xf32>, vector<2x32xf32> -> vector<2x32xf32>
    %c2_72 = arith.constant 2 : index
    %c0_73 = arith.constant 0 : index
    %c0_74 = arith.constant 0 : index
    %110 = vector.load %arg13[%c2_72, %c0_73, %c0_74] : memref<3x1x32xf32, #tpu.memory_space<vmem>>, vector<1x1x32xf32>
    %111 = vector.shape_cast %110 : vector<1x1x32xf32> to vector<1x32xf32>
    %112 = vector.broadcast %111 : vector<1x32xf32> to vector<2x32xf32>
    %113 = arith.addf %109, %112 : vector<2x32xf32>
    %cst_75 = arith.constant 0.000000e+00 : f32
    %114 = vector.broadcast %cst_75 : f32 to vector<2x32xf32>
    %115 = arith.maximumf %113, %114 : vector<2x32xf32>
    %c2_76 = arith.constant 2 : index
    %c0_77 = arith.constant 0 : index
    %c0_78 = arith.constant 0 : index
    %116 = vector.load %arg14[%c2_76, %c0_77, %c0_78] : memref<3x32x4xf32, #tpu.memory_space<vmem>>, vector<1x32x4xf32>
    %117 = vector.shape_cast %116 : vector<1x32x4xf32> to vector<32x4xf32>
    %cst_79 = arith.constant dense<0.000000e+00> : vector<2x4xf32>
    %118 = tpu.matmul %115, %117, %cst_79 {dimension_numbers = #tpu.dot_dimension_numbers<[1], [0], [0], [1], [0, 0, 1, 1], [], []>} : vector<2x32xf32>, vector<32x4xf32>, vector<2x4xf32> -> vector<2x4xf32>
    %c2_80 = arith.constant 2 : index
    %c0_81 = arith.constant 0 : index
    %c0_82 = arith.constant 0 : index
    %119 = vector.load %arg15[%c2_80, %c0_81, %c0_82] : memref<3x1x4xf32, #tpu.memory_space<vmem>>, vector<1x1x4xf32>
    %120 = vector.shape_cast %119 : vector<1x1x4xf32> to vector<1x4xf32>
    %121 = vector.broadcast %120 : vector<1x4xf32> to vector<2x4xf32>
    %122 = arith.addf %118, %121 : vector<2x4xf32>
    %cst_83 = arith.constant 1.000000e+00 : f32
    %123 = vector.broadcast %cst_83 : f32 to vector<2x4xf32>
    %124 = arith.mulf %122, %123 : vector<2x4xf32>
    %cst_84 = arith.constant dense<0xFF800000> : vector<2xf32>
    %125 = vector.multi_reduction <maximumf>, %124, %cst_84 [1] : vector<2x4xf32> to vector<2xf32>
    %126 = vector.shape_cast %125 : vector<2xf32> to vector<2x1xf32>
    %127 = vector.broadcast %126 : vector<2x1xf32> to vector<2x4xf32>
    %128 = arith.subf %124, %127 : vector<2x4xf32>
    %129 = math.exp %128 : vector<2x4xf32>
    %cst_85 = arith.constant dense<0.000000e+00> : vector<2xf32>
    %130 = vector.multi_reduction <add>, %129, %cst_85 [1] : vector<2x4xf32> to vector<2xf32>
    %131 = vector.shape_cast %130 : vector<2xf32> to vector<2x1xf32>
    %132 = tpu.reciprocal %131 {approx = true} : vector<2x1xf32> -> vector<2x1xf32>
    %133 = vector.broadcast %132 : vector<2x1xf32> to vector<2x4xf32>
    %134 = arith.mulf %129, %133 : vector<2x4xf32>
    %c0_86 = arith.constant 0 : index
    %c8 = arith.constant 8 : index
    %135 = vector.load %arg16[%c0_86, %c8] : memref<2x12xf32, #tpu.memory_space<vmem>>, vector<2x4xf32>
    tpu.vector_store %arg16[%c0_86, %c8], %134 {strides = array<i32>} : memref<2x12xf32, #tpu.memory_space<vmem>>, vector<2x4xf32>,
    return
  }
}

</mosaic_0001>

<bundles_post_ra>
// kernel: tpu_custom_call.1
= control target key start
LH: loop header
LB: loop body
LE: loop exit
PB: predicated region body
PF: predicated region fallthrough
CT: control target
= control target key end

     0   :  { %s1156_s0 = inlined_call_operand.hbm [shape: f32[2,16], index: 0, kind: input, shape index: {}]   ;;  %s1157_s1 = inlined_call_operand.hbm [shape: f32[16,64], index: 1, kind: input, shape index: {}]   ;;  %s1158_s2 = inlined_call_operand.hbm [shape: f32[1,64], index: 2, kind: input, shape index: {}]   ;;  %s1159_s3 = inlined_call_operand.vmem [shape: f32[64,32], index: 3, kind: input, shape index: {}]   ;;  %s1160_s4 = inlined_call_operand.vmem [shape: f32[1,32], index: 4, kind: input, shape index: {}]   ;;  %s1161_s5 = inlined_call_operand.vmem [shape: f32[32,96], index: 5, kind: input, shape index: {}]   ;;  %s1162_s6 = inlined_call_operand.vmem [shape: f32[32,96], index: 6, kind: input, shape index: {}]   ;;  %s1163_s7 = inlined_call_operand.vmem [shape: f32[32,96], index: 7, kind: input, shape index: {}]   ;;  %s1164_s8 = inlined_call_operand.vmem [shape: f32[1,96], index: 8, kind: input, shape index: {}]   ;;  %s1165_s9 = inlined_call_operand.hbm [shape: f32[1,96], index: 9, kind: input, shape index: {}]   ;;  %s1166_s10 = inlined_call_operand.hbm [shape: f32[1,96], index: 10, kind: input, shape index: {}]   ;;  %s1167_s11 = inlined_call_operand.hbm [shape: f32[1,96], index: 11, kind: input, shape index: {}]   ;;  %s1168_s12 = inlined_call_operand.vmem [shape: f32[3,32,32], index: 12, kind: input, shape index: {}]   ;;  %s1169_s13 = inlined_call_operand.vmem [shape: f32[3,1,32], index: 13, kind: input, shape index: {}]   ;;  %s1170_s14 = inlined_call_operand.vmem [shape: f32[3,32,4], index: 14, kind: input, shape index: {}]   ;;  %s1171_s15 = inlined_call_operand.vmem [shape: f32[3,1,4], index: 15, kind: input, shape index: {}]   ;;  %s1172_s16 = inlined_call_operand.hbm [shape: f32[2,12], index: 16, kind: output, shape index: {}]  }
   0x1   :  { %1173 = sst [smem:[#allocation19_spill]] %s1156_s0 }
   0x2   :  { %21 = vsyncpa [#allocation3], 0 }
   0x3   :  { %22 = vsyncpa [#allocation6], 0 }
   0x4   :  { %23 = vsyncpa [#allocation9], 0 }
   0x5   :  { %24 = vsyncpa [#allocation12], 0  ;;  %s41_s23 = sshll.u32 %s1157_s1, 4  ;;  %s42_s23 = int_to_ptr.hbm [resolvable:$true] %s41_s23 }
   0x6   :  { %25 = vsyncpa [#allocation4], 0  ;;  %s864_s24 = smov [#allocation5]   ;;  %s78_s28 = sshll.u32 %s1165_s9, 4  ;;  %s79_s28 = int_to_ptr.hbm [resolvable:$true] %s78_s28 }
   0x7   :  { %s43_s25 = sshll.u32 %s864_s24, 4  ;;  %s865_s29 = smov 128   ;;  %s44_s25 = int_to_ptr.vmem [resolvable:$true] %s43_s25 }
   0x8   :  { %s866_s30 = smov 8   ;;  %s867_s0 = smov [#allocation8]  }
   0x9   :  { %49 = dma.hbm_to_vmem [thread:$0]  %s42_s23, 256, %s44_s25, [#allocation6], %s865_s29, %s865_s29, %s866_s30  }
   0xa   :  { %s80_s17 = sshll.u32 %s867_s0, 4  ;;  %s1174_s20 = sld [smem:[#allocation19_spill]]  ;;  %s81_s17 = int_to_ptr.vmem [resolvable:$true] %s80_s17 }
   0xb   :  { %83 = dma.hbm_to_vmem [thread:$0]  %s79_s28, 16, %s81_s17, [#allocation9]  }
   0xc   :  { %s55_s24 = sshll.u32 %s1158_s2, 4  ;;  %s868_s26 = smov [#allocation2]   ;;  %s56_s24 = int_to_ptr.hbm [resolvable:$true] %s55_s24 }
   0xd   :  { %s33_s9 = sshll.u32 %s868_s26, 4  ;;  %s869_s23 = smov [#allocation7]   ;;  %s34_s9 = int_to_ptr.vmem [resolvable:$true] %s33_s9 }
   0xe   :  { %s57_s25 = sshll.u32 %s869_s23, 4  ;;  %s89_s0 = sshll.u32 %s1166_s10, 4  ;;  %s58_s25 = int_to_ptr.vmem [resolvable:$true] %s57_s25  ;;  %s90_s0 = int_to_ptr.hbm [resolvable:$true] %s89_s0 }
   0xf   :  { %60 = dma.hbm_to_vmem [thread:$0]  %s56_s24, 16, %s58_s25, [#allocation6]  }
  0x10   :  { %s31_s1 = sshll.u32 %s1174_s20, 4  ;;  %s100_s17 = sshll.u32 %s1167_s11, 4  ;;  %s32_s1 = int_to_ptr.hbm [resolvable:$true] %s31_s1  ;;  %s101_s17 = int_to_ptr.hbm [resolvable:$true] %s100_s17 }
  0x11   :  { %36 = dma.hbm_to_vmem [thread:$0]  %s32_s1, 32, %s34_s9, [#allocation3]  }
  0x12   :  { %s870_s19 = smov [#allocation10]   ;;  %s871_s20 = smov [#allocation11]  }
  0x13   :  { %s91_s2 = sshll.u32 %s870_s19, 4  ;;  %s102_s1 = sshll.u32 %s871_s20, 4  ;;  %s92_s2 = int_to_ptr.vmem [resolvable:$true] %s91_s2  ;;  %s103_s1 = int_to_ptr.vmem [resolvable:$true] %s102_s1 }
  0x14   :  { %94 = dma.hbm_to_vmem [thread:$0]  %s90_s0, 16, %s92_s2, [#allocation9]  }
  0x15   :  { %105 = dma.hbm_to_vmem [thread:$0]  %s101_s17, 16, %s103_s1, [#allocation12]  }
  0x16   :  { %854 = dma.done.wait [#allocation3], 32  }
  0x17   :  { %855 = vsyncadd [#allocation3], 4294967264 }
  0x18   :  { %856 = dma.done.wait [#allocation6], 272  }
  0x19   :  { %857 = vsyncadd [#allocation6], 4294967024 }
  0x1a   :  { %858 = dma.done.wait [#allocation9], 32  }
  0x1b   :  { %859 = vsyncadd [#allocation9], 4294967264 }
  0x1c   :  { %860 = dma.done.wait [#allocation12], 16  }
  0x1d   :  { %861 = vsyncadd [#allocation12], 4294967280  ;;  %v140_v0 = vld [vmem:[#allocation5 + $0x8] sm:$0xff]  ;;  %v139_v1 = vld [vmem:[#allocation5] sm:$0xff]  ;;  %vm145_vm0 = vcmask 130048   ;;  %vm182_vm1 = vcmask 523264  }
  0x1e   :  { %163 = vmatpush.msra.mxu0 %v140_v0  ;;  %v138_v2 = vld [vmem:[#allocation2] sm:$0x3]  ;;  %v177_v3 = vld [vmem:[%s1159_s3 + $0x38] sm:$0xff]  ;;  %v176_v4 = vld [vmem:[%s1159_s3 + $0x30] sm:$0xff]  ;;  %vm214_vm2 = vcmask 261120   ;;  %s872_s19 = smov 64  }
  0x1f   :  { %194 = vmatpush.msra.mxu1 %v177_v3  ;;  %v175_v5 = vld [vmem:[%s1159_s3 + $0x28] sm:$0xff]  ;;  %v174_v6 = vld [vmem:[%s1159_s3 + $0x20] sm:$0xff]  ;;  %v173_v7 = vld [vmem:[%s1159_s3 + $0x18] sm:$0xff]  ;;  %s873_s2 = smov 96   ;;  %vm404_vm11 = vcmask 25600   ;;  %vm500_vm12 = vcmask 58400  }
  0x20   :  { %164 = vmatpush.msra.mxu0 %v139_v1  ;;  %v172_v8 = vld [vmem:[%s1159_s3 + $0x10] sm:$0xff]  ;;  %v171_v9 = vld [vmem:[%s1159_s3 + $0x8] sm:$0xff]  ;;  %v170_v10 = vld [vmem:[%s1159_s3] sm:$0xff]  ;;  %s594_s0 = sshll.u32 %s1172_s16, 4  ;;  %vm585_vm13 = vcmask 91200   ;;  %s595_s0 = int_to_ptr.hbm [resolvable:$true] %s594_s0 }
  0x21   :  { %607 = vmatmul.msk.f32.vlgmr.msra.gmra.mxu0 %vm145_vm0, %v138_v2  ;;  %195 = vmatpush.msra.mxu1 %v176_v4  ;;  %v209_v11 = vld [vmem:[%s1161_s5 + $0x18] sm:$0xff]  ;;  %v208_v14 = vld [vmem:[%s1161_s5 + $0x10] sm:$0xff]  ;;  %v207_v21 = vld [vmem:[%s1161_s5 + $0x8] sm:$0xff] }
  0x22   :  { %v260_v12 = vld [vmem:[%s1162_s6 + $0x18] sm:$0xff]  ;;  %230 = vmatpush.msra.mxu2 %v209_v11  ;;  %v259_v15 = vld [vmem:[%s1162_s6 + $0x10] sm:$0xff]  ;;  %v258_v22 = vld [vmem:[%s1162_s6 + $0x8] sm:$0xff] }
  0x23   :  { %196 = vmatpush.msra.mxu1 %v175_v5  ;;  %v307_v13 = vld [vmem:[%s1163_s7 + $0x18] sm:$0xff]  ;;  %277 = vmatpush.msra.mxu3 %v260_v12  ;;  %v306_v16 = vld [vmem:[%s1163_s7 + $0x10] sm:$0xff]  ;;  %v305_v23 = vld [vmem:[%s1163_s7 + $0x8] sm:$0xff] }
  0x24   :  { %324 = vmatpush.msrb.mxu0 %v307_v13  ;;  %231 = vmatpush.msra.mxu2 %v208_v14  ;;  %v652_v17 = vld [vmem:[#allocation7] ss:$0 sm:$0xff]  ;;  %v206_v24 = vld [vmem:[%s1161_s5] sm:$0xff]  ;;  %v344_v30 = vld [vmem:[%s1168_s12 + $0x18] sm:$0xff] }
  0x25   :  { %197 = vmatpush.msra.mxu1 %v174_v6  ;;  %278 = vmatpush.msra.mxu3 %v259_v15  ;;  %v257_v25 = vld [vmem:[%s1162_s6] sm:$0xff]  ;;  %v343_v31 = vld [vmem:[%s1168_s12 + $0x10] sm:$0xff]  ;;  %v342_v34 = vld [vmem:[%s1168_s12 + $0x8] sm:$0xff] }
  0x26   :  { %325 = vmatpush.msrb.mxu0 %v306_v16  ;;  %232 = vmatpush.msra.mxu2 %v207_v21  ;;  %v304_v26 = vld [vmem:[%s1163_s7] sm:$0xff]  ;;  %v656_v33 = vld [vmem:[#allocation8] ss:$0 sm:$0xff]  ;;  %v631_v47 = vld [vmem:[%s1168_s12 + $0x58] sm:$0xff] }
  0x27   :  { %198 = vmatpush.msra.mxu1 %v173_v7  ;;  %279 = vmatpush.msra.mxu3 %v258_v22  ;;  %v653_v27 = vld [vmem:[%s1160_s4] ss:$0 sm:$0xff]  ;;  %v630_v48 = vld [vmem:[%s1168_s12 + $0x50] sm:$0xff]  ;;  %v629_v52 = vld [vmem:[%s1168_s12 + $0x48] sm:$0xff] }
  0x28   :  { %326 = vmatpush.msrb.mxu0 %v305_v23  ;;  %233 = vmatpush.msra.mxu2 %v206_v24  ;;  %v655_v32 = vld [vmem:[%s1164_s8] ss:$0 sm:$0xff]  ;;  %v654_v60 = vld [vmem:[#allocation10] ss:$0 sm:$0xff]  ;;  %v657_v62 = vld [vmem:[#allocation11] ss:$0 sm:$0xff] }
  0x29   :  { %199 = vmatpush.msra.mxu1 %v172_v8  ;;  %280 = vmatpush.msra.mxu3 %v257_v25  ;;  %v341_v35 = vld [vmem:[%s1168_s12] sm:$0xff]  ;;  %v619_v15 = vld [vmem:[%s1168_s12 + $0x38] sm:$0xff]  ;;  %v618_v16 = vld [vmem:[%s1168_s12 + $0x30] sm:$0xff] }
  0x2a   :  { %327 = vmatpush.msrb.mxu0 %v304_v26  ;;  %364 = vmatpush.msrb.mxu2 %v344_v30  ;;  %v628_v56 = vld [vmem:[%s1168_s12 + $0x40] sm:$0xff]  ;;  %v374_v21 = vld [vmem:[%s1170_s14 + $0x8] sm:$0xff]  ;;  %v637_v23 = vld [vmem:[%s1170_s14 + $0x58] sm:$0xff] }
  0x2b   :  { %200 = vmatpush.msra.mxu1 %v171_v9  ;;  %v373_v22 = vld [vmem:[%s1170_s14] sm:$0xff]  ;;  %v625_v24 = vld [vmem:[%s1170_s14 + $0x38] sm:$0xff] }
  0x2c   :  { %365 = vmatpush.msrb.mxu2 %v343_v31  ;;  %443 = vmatpush.msra.mxu0 %v619_v15  ;;  %v636_v31 = vld [vmem:[%s1170_s14 + $0x50] sm:$0xff] }
  0x2d   :  { %201 = vmatpush.msra.mxu1 %v170_v10 }
  0x2e   :  { %366 = vmatpush.msrb.mxu2 %v342_v34  ;;  %444 = vmatpush.msra.mxu0 %v618_v16  ;;  %v623_v34 = vld [vmem:[%s1170_s14 + $0x28] sm:$0xff] }
  0x2f   :  { %477 = vmatpush.msrb.mxu1 %v625_v24 }
  0x30   :  { %367 = vmatpush.msrb.mxu2 %v341_v35  ;;  %v634_v35 = vld [vmem:[%s1170_s14 + $0x40] sm:$0xff] }
  0x9e   :  { %v166_v18 = vpop.f32.mrf.mxu0 }
  0x9f   :  { %v167_v19 = vadd.f32 %v652_v17, %v166_v18  ;;  %v617_v17 = vld [vmem:[%s1168_s12 + $0x28] sm:$0xff]  ;;  %v616_v18 = vld [vmem:[%s1168_s12 + $0x20] sm:$0xff]  ;;  %s875_s12 = smov [#allocation13]  }
  0xa0   :  { %445 = vmatpush.msra.mxu0 %v617_v17  ;;  %s592_s25 = sshll.u32 %s875_s12, 4  ;;  %s593_s25 = int_to_ptr.vmem [resolvable:$true] %s592_s25 }
  0xa1   :  { %v169_v20 = vmax.f32 %v167_v19, 0.0  ;;  %v376_v19 = vld [vmem:[%s1170_s14 + $0x18] sm:$0xff] }
  0xa2   :  { %446 = vmatpush.msra.mxu0 %v616_v18  ;;  %396 = vmatpush.msrb.mxu3 %v376_v19 }
  0xa3   :  { %608 = vmatmul.msk.f32.vlgmr.msra.gmra.mxu1 %vm182_vm1, %v169_v20  ;;  %v375_v20 = vld [vmem:[%s1170_s14 + $0x10] sm:$0xff] }
  0xa4   :  { %397 = vmatpush.msrb.mxu3 %v375_v20 }
  0xa6   :  { %398 = vmatpush.msrb.mxu3 %v374_v21 }
  0xa8   :  { %399 = vmatpush.msrb.mxu3 %v373_v22 }
 0x120   :  { %v203_v28 = vpop.f32.mrf.mxu1 }
 0x121   :  { %v204_v29 = vadd.f32 %v653_v27, %v203_v28  ;;  %v658_v27 = vld [vmem:[%s1169_s13] ss:$0 sm:$0xff] }
 0x123   :  { %609 = vmatmul.msk.f32.vlgmr.msra.gmra.mxu2 %vm214_vm2, %v204_v29  ;;  %611 = vmatmul.msk.f32.vlgmr.msra.gmra.mxu3 %vm214_vm2, %v204_v29 }
 0x124   :  { %613 = vmatmul.msk.f32.vlgmr.msrb.gmra.mxu0 %vm214_vm2, %v204_v29  ;;  %528 = vmatpush.msra.mxu2 %v631_v47 }
 0x125   :  { %562 = vmatpush.msra.mxu3 %v637_v23 }
 0x126   :  { %529 = vmatpush.msra.mxu2 %v630_v48 }
 0x127   :  { %563 = vmatpush.msra.mxu3 %v636_v31 }
 0x128   :  { %530 = vmatpush.msra.mxu2 %v629_v52 }
 0x12a   :  { %531 = vmatpush.msra.mxu2 %v628_v56 }
 0x1a1   :  { %v329_v63 = vpop.f32.mrf.mxu0 }
 0x1a2   :  { %v330_v4 = vadd.f32 %v654_v60, %v329_v63 }
 0x1a6   :  { %v235_v36 = vpop.f32.mrf.mxu2  ;;  %v282_v37 = vpop.f32.mrf.mxu3 }
 0x1a7   :  { %v236_v38 = vadd.f32 %v655_v32, %v235_v36  ;;  %v283_v39 = vadd.f32 %v656_v33, %v282_v37  ;;  %v624_v32 = vld [vmem:[%s1170_s14 + $0x30] sm:$0xff]  ;;  %v635_v33 = vld [vmem:[%s1170_s14 + $0x48] sm:$0xff]  ;;  %v622_v36 = vld [vmem:[%s1170_s14 + $0x20] sm:$0xff] }
 0x1a8   :  { %478 = vmatpush.msrb.mxu1 %v624_v32  ;;  %564 = vmatpush.msra.mxu3 %v635_v33  ;;  %v659_v37 = vld [vmem:[%s1169_s13 + $0x2] ss:$0 sm:$0xff] }
 0x1a9   :  { %v610_v40 = vmul.f32 -1.442695, %v236_v38  ;;  %v612_v41 = vmul.f32 -1.442695, %v283_v39  ;;  %v660_v38 = vld [vmem:[%s1169_s13 + $0x1] ss:$0 sm:$0xff] }
 0x1aa   :  { %479 = vmatpush.msrb.mxu1 %v623_v34  ;;  %565 = vmatpush.msra.mxu3 %v634_v35 }
 0x1ab   :  { %664 = vpow2.f32 %v610_v40 }
 0x1ac   :  { %666 = vpow2.f32 %v612_v41  ;;  %480 = vmatpush.msrb.mxu1 %v622_v36 }
 0x1b1   :  { %v665_v42 = vpop.eup %664 }
 0x1b2   :  { %v667_v43 = vpop.eup %666  ;;  %v241_v44 = vadd.f32 1.0, %v665_v42 }
 0x1b3   :  { %v288_v45 = vadd.f32 1.0, %v667_v43 }
 0x1b4   :  { %668 = vrcp.f32 %v241_v44  ;;  %v253_v54 = vand.u32 2147483648, %v241_v44  ;;  %v251_v58 = vand.u32 2147483647, %v241_v44  ;;  %vm247_vm4 = vweird.f32 %v241_v44 }
 0x1b5   :  { %670 = vrcp.f32 %v288_v45  ;;  %v300_v5 = vand.u32 2147483648, %v288_v45  ;;  %vm294_vm8 = vweird.f32 %v288_v45  ;;  %v298_v7 = vand.u32 2147483647, %v288_v45 }
 0x1b6   :  { %v254_v0 = vor.u32 1.1754944e-38, %v253_v54  ;;  %vm252_vm6 = vcmp.eq.f32.partialorder %v251_v58, 8.507059e+37 }
 0x1b7   :  { %v301_v10 = vor.u32 1.1754944e-38, %v300_v5  ;;  %vm299_vm10 = vcmp.eq.f32.partialorder %v298_v7, 8.507059e+37 }
 0x1ba   :  { %v669_v46 = vpop.eup %668 }
 0x1bb   :  { %v671_v49 = vpop.eup %670  ;;  %v243_v50 = vmul.f32 %v669_v46, %v241_v44  ;;  %vm248_vm3 = vweird.f32 %v669_v46 }
 0x1bc   :  { %v290_v51 = vmul.f32 %v671_v49, %v288_v45  ;;  %vm249_vm5 = vmor %vm247_vm4, %vm248_vm3  ;;  %vm295_vm7 = vweird.f32 %v671_v49  ;;  %v661_v45 = vld [vmem:[%s1171_s15] ss:$0 sm:$0xff] }
 0x1bd   :  { %v244_v53 = vsub.f32 1.0, %v243_v50  ;;  %vm296_vm9 = vmor %vm294_vm8, %vm295_vm7 }
 0x1be   :  { %v291_v55 = vsub.f32 1.0, %v290_v51 }
 0x1bf   :  { %v245_v57 = vmul.f32 %v669_v46, %v244_v53  ;;  %v663_v53 = vld [vmem:[%s1171_s15 + $0x2] ss:$0 sm:$0xff] }
 0x1c0   :  { %v292_v59 = vmul.f32 %v671_v49, %v291_v55 }
 0x1c1   :  { %v246_v61 = vadd.f32 %v669_v46, %v245_v57 }
 0x1c2   :  { %v293_v3 = vadd.f32 %v671_v49, %v292_v59 }
 0x1c3   :  { %v250_v1 = vsel %vm249_vm5, %v669_v46, %v246_v61 }
 0x1c4   :  { %v255_v2 = vsel %vm252_vm6, %v254_v0, %v250_v1  ;;  %v297_v9 = vsel %vm296_vm9, %v671_v49, %v293_v3  ;;  %v662_v49 = vld [vmem:[%s1171_s15 + $0x1] ss:$0 sm:$0xff]  ;;  %s874_s15 = smov 4  }
 0x1c5   :  { %v336_v6 = vmul.f32 %v657_v62, %v255_v2  ;;  %v302_v11 = vsel %vm299_vm10, %v301_v10, %v297_v9 }
 0x1c6   :  { %v339_v12 = vsub.f32 1.0, %v302_v11 }
 0x1c7   :  { %v337_v8 = vadd.f32 %v336_v6, %v330_v4 }
 0x1c9   :  { %672 = vtanh.f32 %v337_v8 }
 0x1cf   :  { %v673_v13 = vpop.eup %672 }
 0x1d0   :  { %v340_v14 = vmul.f32 %v673_v13, %v339_v12 }
 0x1d2   :  { %512 = vrot.lane.b32.xlu0 %v340_v14, %s872_s19  ;;  %614 = vmatmul.msk.f32.vlgmr.msrb.gmra.mxu2 %vm214_vm2, %v340_v14 }
 0x1da   :  { %427 = vrot.lane.b32.xlu0 %v340_v14, %s873_s2 }
 0x244   :  { %v513_v25 = vpop.permute.xlu0 %512 }
 0x245   :  { %633 = vmatmul.msk.f32.vlgmr.msra.gmra.mxu2 %vm214_vm2, %v513_v25 }
 0x24c   :  { %v428_v26 = vpop.permute.xlu0 %427 }
 0x24d   :  { %621 = vmatmul.msk.f32.vlgmr.msra.gmra.mxu0 %vm214_vm2, %v428_v26 }
 0x255   :  { %v369_v28 = vpop.f32.mrf.mxu2 }
 0x256   :  { %v370_v29 = vadd.f32 %v658_v27, %v369_v28 }
 0x258   :  { %v372_v30 = vmax.f32 %v370_v29, 0.0 }
 0x25a   :  { %615 = vmatmul.msk.f32.vlgmr.msrb.gmra.mxu3 %vm214_vm2, %v372_v30 }
 0x2c8   :  { %v533_v39 = vpop.f32.mrf.mxu2 }
 0x2c9   :  { %v534_v40 = vadd.f32 %v659_v37, %v533_v39 }
 0x2ca   :  { %v448_v41 = vpop.f32.mrf.mxu0 }
 0x2cb   :  { %v536_v42 = vmax.f32 %v534_v40, 0.0  ;;  %v449_v43 = vadd.f32 %v660_v38, %v448_v41 }
 0x2cd   :  { %v451_v44 = vmax.f32 %v449_v43, 0.0  ;;  %639 = vmatmul.msk.f32.vlgmr.msra.gmra.mxu3 %vm214_vm2, %v536_v42 }
 0x2cf   :  { %627 = vmatmul.msk.f32.vlgmr.msrb.gmra.mxu1 %vm214_vm2, %v451_v44 }
 0x2dd   :  { %v401_v46 = vpop.f32.mrf.mxu3 }
 0x2de   :  { %v402_v47 = vadd.f32 %v661_v45, %v401_v46 }
 0x2e0   :  { %v405_v48 = vsel %vm404_vm11, %v402_v47, -inf }
 0x2e1   :  { %406 = vmax.xlane.f32.xlu2 %v405_v48 }
 0x34c   :  { %v482_v50 = vpop.f32.mrf.mxu1 }
 0x34d   :  { %v483_v51 = vadd.f32 %v662_v49, %v482_v50 }
 0x34f   :  { %v485_v52 = vsel %vm404_vm11, %v483_v51, -inf }
 0x350   :  { %486 = vmax.xlane.f32.xlu1 %v485_v52  ;;  %v567_v54 = vpop.f32.mrf.mxu3 }
 0x351   :  { %v568_v55 = vadd.f32 %v663_v53, %v567_v54 }
 0x353   :  { %v570_v59 = vsel %vm404_vm11, %v568_v55, -inf }
 0x354   :  { %v407_v56 = vpop.xlane.xlu2 %406 }
 0x355   :  { %v408_v57 = vsub.f32 %v402_v47, %v407_v56 }
 0x357   :  { %v409_v58 = vmul.f32 1.442695, %v408_v57 }
 0x358   :  { %571 = vmax.xlane.f32.xlu1 %v570_v59 }
 0x359   :  { %674 = vpow2.f32 %v409_v58 }
 0x35f   :  { %v675_v60 = vpop.eup %674 }
 0x360   :  { %v411_v61 = vsel %vm404_vm11, %v675_v60, 0.0 }
 0x361   :  { %412 = vadd.xlane.f32.xlu1 %v411_v61 }
 0x3c3   :  { %v487_v62 = vpop.xlane.xlu1 %486 }
 0x3c4   :  { %v488_v63 = vsub.f32 %v483_v51, %v487_v62 }
 0x3c6   :  { %v489_v0 = vmul.f32 1.442695, %v488_v63 }
 0x3c8   :  { %676 = vpow2.f32 %v489_v0 }
 0x3cb   :  { %v572_v1 = vpop.xlane.xlu1 %571 }
 0x3cc   :  { %v573_v2 = vsub.f32 %v568_v55, %v572_v1 }
 0x3ce   :  { %v677_v3 = vpop.eup %676  ;;  %v574_v4 = vmul.f32 1.442695, %v573_v2 }
 0x3cf   :  { %v491_v5 = vsel %vm404_vm11, %v677_v3, 0.0 }
 0x3d0   :  { %678 = vpow2.f32 %v574_v4  ;;  %492 = vadd.xlane.f32.xlu2 %v491_v5 }
 0x3d4   :  { %v413_v6 = vpop.xlane.xlu1 %412 }
 0x3d5   :  { %680 = vrcp.f32 %v413_v6 }
 0x3d6   :  { %v679_v7 = vpop.eup %678 }
 0x3d7   :  { %v576_v8 = vsel %vm404_vm11, %v679_v7, 0.0 }
 0x3d8   :  { %577 = vadd.xlane.f32.xlu0 %v576_v8 }
 0x3db   :  { %v681_v9 = vpop.eup %680 }
 0x3dc   :  { %v415_v10 = vmul.f32 %v681_v9, %v675_v60 }
 0x3de   :  { %416 = vst.msk [vmem:[#allocation13] sm:$0x3] %vm404_vm11, %v415_v10 }
 0x443   :  { %v493_v11 = vpop.xlane.xlu2 %492 }
 0x444   :  { %682 = vrcp.f32 %v493_v11 }
 0x44a   :  { %v683_v12 = vpop.eup %682 }
 0x44b   :  { %v578_v13 = vpop.xlane.xlu0 %577  ;;  %v495_v14 = vmul.f32 %v683_v12, %v677_v3 }
 0x44c   :  { %684 = vrcp.f32 %v578_v13 }
 0x44d   :  { %497 = vrot.lane.b32.xlu2 %v495_v14, %s874_s15 }
 0x452   :  { %v685_v15 = vpop.eup %684 }
 0x453   :  { %v580_v16 = vmul.f32 %v685_v15, %v679_v7 }
 0x455   :  { %582 = vrot.lane.b32.xlu1 %v580_v16, %s866_s30 }
 0x4a7   :  { %v498_v17 = vpop.permute.xlu2 %497 }
 0x4a8   :  { %501 = vst.msk [vmem:[#allocation13] sm:$0x3] %vm500_vm12, %v498_v17 }
 0x4c7   :  { %v583_v18 = vpop.permute.xlu1 %582 }
 0x4c8   :  { %586 = vst.msk [vmem:[#allocation13] sm:$0x3] %vm585_vm13, %v583_v18 }
 0x4c9   :  { %597 = dma.vmem_to_hbm [thread:$0]  %s593_s25, 32, %s595_s0, [#allocation4]  }
 0x4ca   :  { %862 = dma.done.wait [#allocation4], 32  }
 0x4cb   :  { %863 = vsyncadd [#allocation4], 4294967264 }
 0x4cc   :  { %602 = vsyncpa [#allocation3], 1 }
 0x4cd   :  { %603 = vsyncpa [#allocation6], 1 }
 0x4ce   :  { %604 = vsyncpa [#allocation9], 1 }
 0x4cf   :  { %605 = vsyncpa [#allocation12], 1 }
 0x4d0   :  { %606 = vsyncpa [#allocation4], 1 }

</bundles_post_ra>
